<compile_context>
chip_gen: v6e
topology: v6e:2x2x1
jax: 0.10.0
libtpu: 0.0.40
codegen_flags: <defaults>
</compile_context>

<pallas_src>
import functools

import jax
import jax.numpy as jnp
from jax.experimental import pallas as pl
from jax.experimental.pallas import tpu as pltpu


def _round_up(x: int, m: int) -> int:
    return ((x + m - 1) // m) * m


def _vmem_capacity_bytes() -> int:
    """Per-TensorCore VMEM capacity; conservative fallback if the query fails."""
    try:
        info = pltpu.get_tpu_info()
        cap = int(getattr(info, "vmem_capacity_bytes", 0))
        if cap > 0:
            return cap
    except Exception:  # off-TPU trace / older runtime
        pass
    return 64 * 1024 * 1024  # v7x per-core VMEM (smallest across v5e/v6e/v7x)


def _tile_bytes(tile_n, d_in, h, d_out, x_itemsize, out_itemsize):
    # Per-N-tile VMEM: double-buffered streamed x / y tiles + f32 hidden +
    # bf16 hidden copy + f32 pre-cast second-matmul result.
    stream = 2 * tile_n * d_in * x_itemsize + 2 * tile_n * d_out * out_itemsize
    interm = tile_n * h * (4 + 2) + tile_n * d_out * 4
    return stream + interm


def _choose_tile_n(n, d_in, h, d_out, x_itemsize, out_itemsize, tile_budget):
    """Largest MXU/lane-friendly batch tile that fits the VMEM budget while
    keeping >=4 grid steps (>=2 per TensorCore on v7x) when N allows it."""
    n8 = _round_up(max(n, 8), 8)
    if n8 < 4 * 128:                      # small batches: one/few tiles
        return n8 if n8 <= 128 else 128
    cap = min(1024, max(128, ((n8 // 4) // 128) * 128))
    for t in range(cap, 127, -128):
        if _tile_bytes(t, d_in, h, d_out, x_itemsize, out_itemsize) <= tile_budget:
            return t
    return 128


def two_layer_kernel(x_ref, w1_ref, b1_ref, w2_ref, b2_ref, o_ref):
    # In-kernel bf16 cast of the streamed x tile (no wrapper pad/cast pass).
    x = x_ref[...].astype(jnp.bfloat16)                        # (TILE_N, D_in)
    h = jnp.dot(x, w1_ref[...], preferred_element_type=jnp.float32)
    h = jnp.maximum(h + b1_ref[...], 0.0)                      # f32 bias + ReLU (VPU)
    y = jnp.dot(h.astype(jnp.bfloat16), w2_ref[...],
                preferred_element_type=jnp.float32)
    o_ref[...] = (y + b2_ref[...]).astype(o_ref.dtype)


def prepare_params(w1, b1, w2, b2):
    """One-time weight layout prep (kept OUT of the per-call jitted path).

    Expects pre-transposed weights: w1 (D_in, H), w2 (H, D_out) --
    PyTorch nn.Linear stores (out_features, in_features); transpose once.
    """
    return (jnp.asarray(w1, jnp.bfloat16),
            jnp.asarray(b1, jnp.float32).reshape(1, -1),
            jnp.asarray(w2, jnp.bfloat16),
            jnp.asarray(b2, jnp.float32).reshape(1, -1))


@functools.partial(jax.jit, static_argnames=("tile_n",))
def two_layer_net(x, w1_bf16, b1_row, w2_bf16, b2_row, *, tile_n=None):
    """x: (N, D_in); w1_bf16: (D_in, H) bf16; b1_row: (1, H) f32;
    w2_bf16: (H, D_out) bf16; b2_row: (1, D_out) f32. Returns (N, D_out), x.dtype."""
    N, D_in = x.shape
    H = w1_bf16.shape[1]
    D_out = w2_bf16.shape[1]
    out_dtype = x.dtype
    x_itemsize = jnp.dtype(x.dtype).itemsize
    out_itemsize = jnp.dtype(out_dtype).itemsize

    # --- generation-aware VMEM budget -> tile size (all static, trace-time) --
    vmem_cap = _vmem_capacity_bytes()
    vmem_ceiling = max(16 * 1024 * 1024, vmem_cap - 8 * 1024 * 1024)  # headroom
    resident = D_in * H * 2 + H * D_out * 2 + (H + D_out) * 4        # Buffered(1)
    tile_budget = max(512 * 1024, vmem_ceiling - resident - 2 * 1024 * 1024)

    if tile_n is None:
        tile_n = _choose_tile_n(N, D_in, H, D_out, x_itemsize, out_itemsize,
                                tile_budget)
    tile_n = max(8, (min(int(tile_n), _round_up(N, 8)) // 8) * 8)  # multiple of 8

    # Pad the batch only if ragged w.r.t. the tile (padded rows compute
    # relu(b1)@W2+b2 garbage and are sliced away; demo shapes: no pad/slice).
    N_p = _round_up(N, tile_n)
    x_in = x if N_p == N else jnp.pad(x, ((0, N_p - N), (0, 0)))

    grid = (N_p // tile_n,)
    vmem_request = (resident
                    + _tile_bytes(tile_n, D_in, H, D_out, x_itemsize, out_itemsize)
                    + 2 * 1024 * 1024)
    vmem_limit = int(min(max(vmem_request, 16 * 1024 * 1024), vmem_ceiling))

    flops = 2 * N_p * (D_in * H + H * D_out)
    bytes_accessed = (x_in.size * x_itemsize + w1_bf16.size * 2 + w2_bf16.size * 2
                      + b1_row.size * 4 + b2_row.size * 4
                      + N_p * D_out * out_itemsize)

    def resident_spec(shape):
        # Constant block index -> stays in VMEM; single-buffered (no 2x cost).
        return pl.BlockSpec(shape, lambda i: (0, 0), pipeline_mode=pl.Buffered(1))

    out_p = pl.pallas_call(
        two_layer_kernel,
        out_shape=jax.ShapeDtypeStruct((N_p, D_out), out_dtype),
        grid_spec=pltpu.PrefetchScalarGridSpec(
            num_scalar_prefetch=0,
            grid=grid,
            in_specs=[
                pl.BlockSpec((tile_n, D_in), lambda i: (i, 0)),   # x: streams
                resident_spec((D_in, H)),                         # W1: resident
                resident_spec((1, H)),                            # b1: resident
                resident_spec((H, D_out)),                        # W2: resident
                resident_spec((1, D_out)),                        # b2: resident
            ],
            out_specs=pl.BlockSpec((tile_n, D_out), lambda i: (i, 0)),
        ),
        compiler_params=pltpu.CompilerParams(
            dimension_semantics=("parallel",),   # batch axis -> megacore-able
            vmem_limit_bytes=vmem_limit,
        ),
        cost_estimate=pl.CostEstimate(
            flops=flops, transcendentals=0, bytes_accessed=bytes_accessed),
    )(x_in, w1_bf16, b1_row, w2_bf16, b2_row)

    return out_p if N_p == N else out_p[:N]


if __name__ == "__main__":
    # N x D_in -> H -> D_out, consistent with TwoLayerNet.
    N, D_in, H, D_out = 512, 64, 128, 32

    key = jax.random.PRNGKey(0)
    kx, kw1, kb1, kw2, kb2 = jax.random.split(key, 5)

    x = jax.random.normal(kx, (N, D_in), dtype=jnp.float32)

    # nn.Linear-style init: U(-1/sqrt(fan_in), 1/sqrt(fan_in)); weights kept
    # pre-transposed ((D_in,H),(H,D_out)) relative to PyTorch's (out,in).
    bound1 = 1.0 / jnp.sqrt(D_in)
    bound2 = 1.0 / jnp.sqrt(H)
    w1 = jax.random.uniform(kw1, (D_in, H), jnp.float32, -bound1, bound1)
    b1 = jax.random.uniform(kb1, (H,), jnp.float32, -bound1, bound1)
    w2 = jax.random.uniform(kw2, (H, D_out), jnp.float32, -bound2, bound2)
    b2 = jax.random.uniform(kb2, (D_out,), jnp.float32, -bound2, bound2)

    # One-time layout prep (cached; not repeated per forward call).
    params = prepare_params(w1, b1, w2, b2)
    params = jax.block_until_ready(params)

    y = two_layer_net(x, *params)
    jax.block_until_ready(y)
    assert y.shape == (N, D_out)
    assert y.dtype == x.dtype

    # Reference with matching bf16 operand quantization / f32 accumulation.
    xq = x.astype(jnp.bfloat16).astype(jnp.float32)
    w1q = w1.astype(jnp.bfloat16).astype(jnp.float32)
    w2q = w2.astype(jnp.bfloat16).astype(jnp.float32)
    h_ref = jnp.maximum(xq @ w1q + b1, 0.0)
    y_ref = h_ref.astype(jnp.bfloat16).astype(jnp.float32) @ w2q + b2
    assert jnp.allclose(y, y_ref, atol=1e-2, rtol=1e-2), (
        float(jnp.max(jnp.abs(y - y_ref))))

    # Loose sanity vs full-f32 reference (operands were bf16-quantized).
    y_f32 = jnp.maximum(x @ w1 + b1, 0.0) @ w2 + b2
    assert jnp.allclose(y, y_f32, atol=5e-2, rtol=5e-2)

    print("KERNEL_OK")
</pallas_src>

<mosaic_0001>
module attributes {stable_mosaic.version = 11 : i64} {
  func.func @two_layer_kernel(%arg0: i32, %arg1: memref<128x64xf32, #tpu.memory_space<vmem>>, %arg2: memref<64x128xbf16, #tpu.memory_space<vmem>>, %arg3: memref<1x128xf32, #tpu.memory_space<vmem>>, %arg4: memref<128x32xbf16, #tpu.memory_space<vmem>>, %arg5: memref<1x32xf32, #tpu.memory_space<vmem>>, %arg6: memref<128x32xf32, #tpu.memory_space<vmem>>) attributes {dimension_semantics = [#tpu.dimension_semantics<parallel>], iteration_bounds = array<i64: 4>, scalar_prefetch = 0 : i64, scratch_operands = 0 : i64, tpu.core_type = #tpu.core_type<tc>, window_params = [{transform_indices = @transform_0, window_bounds = array<i64: 128, 64>}, {pipeline_mode = #tpu.pipeline_mode<synchronous>, transform_indices = @transform_1, window_bounds = array<i64: 64, 128>}, {pipeline_mode = #tpu.pipeline_mode<synchronous>, transform_indices = @transform_2, window_bounds = array<i64: 1, 128>}, {pipeline_mode = #tpu.pipeline_mode<synchronous>, transform_indices = @transform_3, window_bounds = array<i64: 128, 32>}, {pipeline_mode = #tpu.pipeline_mode<synchronous>, transform_indices = @transform_4, window_bounds = array<i64: 1, 32>}, {transform_indices = @transform_5, window_bounds = array<i64: 128, 32>}]} {
    %c0 = arith.constant 0 : index
    %c0_0 = arith.constant 0 : index
    %0 = vector.load %arg1[%c0, %c0_0] : memref<128x64xf32, #tpu.memory_space<vmem>>, vector<128x64xf32>
    %1 = arith.truncf %0 : vector<128x64xf32> to vector<128x64xbf16>
    %c0_1 = arith.constant 0 : index
    %c0_2 = arith.constant 0 : index
    %2 = vector.load %arg2[%c0_1, %c0_2] : memref<64x128xbf16, #tpu.memory_space<vmem>>, vector<64x128xbf16>
    %cst = arith.constant dense<0.000000e+00> : vector<128x128xf32>
    %3 = tpu.matmul %1, %2, %cst {dimension_numbers = #tpu.dot_dimension_numbers<[1], [0], [0], [1], [0, 0, 1, 1], [], []>} : vector<128x64xbf16>, vector<64x128xbf16>, vector<128x128xf32> -> vector<128x128xf32>
    %c0_3 = arith.constant 0 : index
    %c0_4 = arith.constant 0 : index
    %4 = vector.load %arg3[%c0_3, %c0_4] : memref<1x128xf32, #tpu.memory_space<vmem>>, vector<1x128xf32>
    %5 = vector.broadcast %4 : vector<1x128xf32> to vector<128x128xf32>
    %6 = arith.addf %3, %5 : vector<128x128xf32>
    %cst_5 = arith.constant 0.000000e+00 : f32
    %7 = vector.broadcast %cst_5 : f32 to vector<128x128xf32>
    %8 = arith.maximumf %6, %7 : vector<128x128xf32>
    %9 = arith.truncf %8 : vector<128x128xf32> to vector<128x128xbf16>
    %c0_6 = arith.constant 0 : index
    %c0_7 = arith.constant 0 : index
    %10 = vector.load %arg4[%c0_6, %c0_7] : memref<128x32xbf16, #tpu.memory_space<vmem>>, vector<128x32xbf16>
    %cst_8 = arith.constant dense<0.000000e+00> : vector<128x32xf32>
    %11 = tpu.matmul %9, %10, %cst_8 {dimension_numbers = #tpu.dot_dimension_numbers<[1], [0], [0], [1], [0, 0, 1, 1], [], []>} : vector<128x128xbf16>, vector<128x32xbf16>, vector<128x32xf32> -> vector<128x32xf32>
    %c0_9 = arith.constant 0 : index
    %c0_10 = arith.constant 0 : index
    %12 = vector.load %arg5[%c0_9, %c0_10] : memref<1x32xf32, #tpu.memory_space<vmem>>, vector<1x32xf32>
    %13 = vector.broadcast %12 : vector<1x32xf32> to vector<128x32xf32>
    %14 = arith.addf %11, %13 : vector<128x32xf32>
    %c0_11 = arith.constant 0 : index
    %c0_12 = arith.constant 0 : index
    %15 = vector.load %arg6[%c0_11, %c0_12] : memref<128x32xf32, #tpu.memory_space<vmem>>, vector<128x32xf32>
    tpu.vector_store %arg6[%c0_11, %c0_12], %14 {strides = array<i32>} : memref<128x32xf32, #tpu.memory_space<vmem>>, vector<128x32xf32>,
    return
  }
  func.func @transform_0(%arg0: i32) -> (i32, i32) {
    %c0_i32 = arith.constant 0 : i32
    %c0_i32_0 = arith.constant 0 : i32
    return %arg0, %c0_i32 : i32, i32
  }
  func.func @transform_1(%arg0: i32) -> (i32, i32) {
    %c0_i32 = arith.constant 0 : i32
    %c0_i32_0 = arith.constant 0 : i32
    %c0_i32_1 = arith.constant 0 : i32
    return %c0_i32, %c0_i32_0 : i32, i32
  }
  func.func @transform_2(%arg0: i32) -> (i32, i32) {
    %c0_i32 = arith.constant 0 : i32
    %c0_i32_0 = arith.constant 0 : i32
    %c0_i32_1 = arith.constant 0 : i32
    return %c0_i32, %c0_i32_0 : i32, i32
  }
  func.func @transform_3(%arg0: i32) -> (i32, i32) {
    %c0_i32 = arith.constant 0 : i32
    %c0_i32_0 = arith.constant 0 : i32
    %c0_i32_1 = arith.constant 0 : i32
    return %c0_i32, %c0_i32_0 : i32, i32
  }
  func.func @transform_4(%arg0: i32) -> (i32, i32) {
    %c0_i32 = arith.constant 0 : i32
    %c0_i32_0 = arith.constant 0 : i32
    %c0_i32_1 = arith.constant 0 : i32
    return %c0_i32, %c0_i32_0 : i32, i32
  }
  func.func @transform_5(%arg0: i32) -> (i32, i32) {
    %c0_i32 = arith.constant 0 : i32
    %c0_i32_0 = arith.constant 0 : i32
    return %arg0, %c0_i32 : i32, i32
  }
}

</mosaic_0001>

<bundles_post_ra>
// kernel: two_layer_net.1
= control target key start
LH: loop header
LB: loop body
LE: loop exit
PB: predicated region body
PF: predicated region fallthrough
CT: control target
= control target key end

     0   :  { %s870_s18 = smov 0   ;;  %s996_s0 = inlined_call_operand.vmem [shape: f32[512,64], index: 0, kind: input, shape index: {}]   ;;  %s997_s1 = inlined_call_operand.vmem [shape: bf16[64,128], index: 1, kind: input, shape index: {}]   ;;  %s998_s2 = inlined_call_operand.vmem [shape: f32[1,128], index: 2, kind: input, shape index: {}]   ;;  %s999_s3 = inlined_call_operand.vmem [shape: bf16[128,32], index: 3, kind: input, shape index: {}]   ;;  %s1000_s4 = inlined_call_operand.vmem [shape: f32[1,32], index: 4, kind: input, shape index: {}]   ;;  %s1001_s5 = inlined_call_operand.vmem [shape: f32[512,32], index: 5, kind: output, shape index: {}]  }
   0x1 LB: > { %s679_s19 = sadd.s32 4294967295, %s838_s18   ;;  %p683_p0 = scmp.ge.s32.totalorder %s838_s18, 1  ;;  %s838_s18 = sphi %s870_s18, %s15_s18  }
   0x2   : > { %p188_p1 = scmp.lt.s32.totalorder %s838_s18, 5 }
   0x4   : > { %p189_p2 = pnand %p683_p0, %p188_p1 }
   0x5   : > { %s684_s22 = sshll.u32 (!%p189_p2), %s679_s19, 4 }
   0x6   : > { %192 = sbr.rel (%p189_p2) target bundleno = 460 (0x1cc), region = 40  ;;  %p217_p3 = scmp.lt.s32.totalorder (!%p189_p2), %s684_s22, 63 }
   0xb   : > { %v820_v0 = vld [vmem:[%s997_s1 + $0x18] sm:$0xff]   ;;  %v821_v1 = vld [vmem:[%s997_s1 + $0x10] sm:$0xff]   ;;  %v822_v2 = vld [vmem:[%s997_s1 + $0x8] sm:$0xff]   ;;  %s1003_s22 = smov (!%p217_p3, %s684_s22), 63  ;;  %vm292_vm0 = vcmask 523264   ;;  %vm606_vm1 = vcmask 261120  }
   0xc   : > { %740 = vmatprep.subr.bf16.mxu0 %v820_v0  ;;  %v824_v3 = vld [vmem:[%s999_s3 + $0x38] sm:$0xff]   ;;  %s685_s29 = sshll.u32 %s1003_s22, 3  ;;  %v825_v4 = vld [vmem:[%s999_s3 + $0x30] sm:$0xff]   ;;  %v823_v7 = vld [vmem:[%s997_s1] sm:$0xff]  }
   0xd   : > { %741 = vmatpush3.bf16.msra.mxu0 %v820_v0  ;;  %s898_s7 = scalar_lea.vmem %s996_s0, %s685_s29  ;;  %796 = vmatprep.subr.bf16.mxu1 %v824_v3  ;;  %v826_v9 = vld [vmem:[%s999_s3 + $0x28] sm:$0xff]   ;;  %v827_v15 = vld [vmem:[%s999_s3 + $0x20] sm:$0xff]   ;;  %v828_v19 = vld [vmem:[%s999_s3 + $0x18] sm:$0xff]   ;;  %s959_s8 = scalar_lea.vmem %s1001_s5, %s685_s29 }
   0xe   : > { %742 = vmatprep.subr.bf16.mxu0 %v821_v1  ;;  %v229_v5 = vld [vmem:[%s898_s7] sm:$0xff]  ;;  %v230_v6 = vld [vmem:[%s898_s7 + $0x8] sm:$0xff]  ;;  %804 = vmatpush3.bf16.msra.mxu1 %v824_v3  ;;  %v231_v10 = vld [vmem:[%s898_s7 + $0x10] sm:$0xff] }
   0xf   : > { %v245_v8 = vpack.c.bf16 %v230_v6, %v229_v5  ;;  %797 = vmatprep.subr.bf16.mxu1 %v825_v4  ;;  %v232_v11 = vld [vmem:[%s898_s7 + $0x18] sm:$0xff]  ;;  %v233_v12 = vld [vmem:[%s898_s7 + $0x20] sm:$0xff]  ;;  %v234_v13 = vld [vmem:[%s898_s7 + $0x28] sm:$0xff] }
  0x10   : > { %v246_v14 = vpack.c.bf16 %v232_v11, %v231_v10  ;;  %v247_v16 = vpack.c.bf16 %v234_v13, %v233_v12  ;;  %v235_v17 = vld [vmem:[%s898_s7 + $0x30] sm:$0xff]  ;;  %v236_v18 = vld [vmem:[%s898_s7 + $0x38] sm:$0xff]  ;;  %v237_v20 = vld [vmem:[%s898_s7 + $0x40] sm:$0xff] }
  0x11   : > { %743 = vmatpush3.bf16.msra.mxu0 %v821_v1  ;;  %748 = vmatprep.mubr.msk.bf16.mxu0 %vm292_vm0, %v245_v8  ;;  %v238_v21 = vld [vmem:[%s898_s7 + $0x48] sm:$0xff]  ;;  %v248_v22 = vpack.c.bf16 %v236_v18, %v235_v17  ;;  %v239_v24 = vld [vmem:[%s898_s7 + $0x50] sm:$0xff]  ;;  %v240_v25 = vld [vmem:[%s898_s7 + $0x58] sm:$0xff] }
  0x12   : > { %744 = vmatprep.subr.bf16.mxu0 %v822_v2  ;;  %805 = vmatpush3.bf16.msra.mxu1 %v825_v4  ;;  %v249_v23 = vpack.c.bf16 %v238_v21, %v237_v20  ;;  %v241_v26 = vld [vmem:[%s898_s7 + $0x60] sm:$0xff]  ;;  %v242_v27 = vld [vmem:[%s898_s7 + $0x68] sm:$0xff]  ;;  %v250_v28 = vpack.c.bf16 %v240_v25, %v239_v24  ;;  %v243_v30 = vld [vmem:[%s898_s7 + $0x70] sm:$0xff] }
  0x13   : > { %798 = vmatprep.subr.bf16.mxu1 %v826_v9  ;;  %v251_v29 = vpack.c.bf16 %v242_v27, %v241_v26  ;;  %v244_v31 = vld [vmem:[%s898_s7 + $0x78] sm:$0xff]  ;;  %v829_v33 = vld [vmem:[%s999_s3 + $0x10] sm:$0xff]   ;;  %v830_v34 = vld [vmem:[%s999_s3 + $0x8] sm:$0xff]  }
  0x14   : > { %v252_v32 = vpack.c.bf16 %v244_v31, %v243_v30  ;;  %v831_v35 = vld [vmem:[%s999_s3] sm:$0xff]  }
  0x15   : > { %745 = vmatpush3.bf16.msra.mxu0 %v822_v2  ;;  %v688_v38 = vld [vmem:[%s998_s2] ss:$0 sm:$0xff] }
  0x16   : > { %746 = vmatprep.subr.bf16.mxu0 %v823_v7  ;;  %806 = vmatpush3.bf16.msra.mxu1 %v826_v9 }
  0x17   : > { %799 = vmatprep.subr.bf16.mxu1 %v827_v15 }
  0x19   : > { %747 = vmatpush3.bf16.msra.mxu0 %v823_v7 }
  0x1a   : > { %764 = vmatprep.subr.bf16.mxu0 %v824_v3  ;;  %807 = vmatpush3.bf16.msra.mxu1 %v827_v15 }
  0x1b   : > { %800 = vmatprep.subr.bf16.mxu1 %v828_v19 }
  0x1c   : > { %749 = vmatmul.mubr.msk.bf16.vlgmr.msra.gmra.mxu0 %vm292_vm0, %v246_v14 }
  0x1d   : > { %752 = vmatprep.mubr.msk.bf16.mxu0 %vm292_vm0, %v247_v16  ;;  %765 = vmatpush3.bf16.msra.mxu0 %v824_v3 }
  0x1e   : > { %766 = vmatprep.subr.bf16.mxu0 %v825_v4  ;;  %808 = vmatpush3.bf16.msra.mxu1 %v828_v19 }
  0x1f   : > { %801 = vmatprep.subr.bf16.mxu1 %v829_v33 }
  0x21   : > { %767 = vmatpush3.bf16.msra.mxu0 %v825_v4 }
  0x22   : > { %768 = vmatprep.subr.bf16.mxu0 %v826_v9  ;;  %809 = vmatpush3.bf16.msra.mxu1 %v829_v33 }
  0x23   : > { %802 = vmatprep.subr.bf16.mxu1 %v830_v34 }
  0x24   : > { %753 = vmatmul.mubr.msk.bf16.gmra.mxu0 %vm292_vm0, %v248_v22 }
  0x25   : > { %756 = vmatprep.mubr.msk.bf16.mxu0 %vm292_vm0, %v249_v23  ;;  %769 = vmatpush3.bf16.msra.mxu0 %v826_v9 }
  0x26   : > { %770 = vmatprep.subr.bf16.mxu0 %v827_v15  ;;  %810 = vmatpush3.bf16.msra.mxu1 %v830_v34 }
  0x27   : > { %803 = vmatprep.subr.bf16.mxu1 %v831_v35 }
  0x29   : > { %771 = vmatpush3.bf16.msra.mxu0 %v827_v15 }
  0x2a   : > { %772 = vmatprep.subr.bf16.mxu0 %v828_v19  ;;  %811 = vmatpush3.bf16.msra.mxu1 %v831_v35 }
  0x2c   : > { %757 = vmatmul.mubr.msk.bf16.gmra.mxu0 %vm292_vm0, %v250_v28 }
  0x2d   : > { %760 = vmatprep.mubr.msk.bf16.mxu0 %vm292_vm0, %v251_v29  ;;  %773 = vmatpush3.bf16.msra.mxu0 %v828_v19  ;;  %v701_v29 = vld [vmem:[%s1000_s4] ss:$0 sm:$0xff] }
  0x2e   : > { %774 = vmatprep.subr.bf16.mxu0 %v829_v33 }
  0x31   : > { %775 = vmatpush3.bf16.msra.mxu0 %v829_v33 }
  0x32   : > { %776 = vmatprep.subr.bf16.mxu0 %v830_v34 }
  0x34   : > { %761 = vmatmul.mubr.msk.bf16.gmra.mxu0 %vm292_vm0, %v252_v32 }
  0x35   : > { %777 = vmatpush3.bf16.msra.mxu0 %v830_v34 }
  0x36   : > { %778 = vmatprep.subr.bf16.mxu0 %v831_v35 }
  0x39   : > { %779 = vmatpush3.bf16.msra.mxu0 %v831_v35 }
  0xdc   : > { %v750_v36 = vpop.f32.mrf.mxu0 }
  0xdd   : > { %v360_v42 = vadd.f32 %v750_v36, %v688_v38 }
  0xde   : > { %v351_v37 = vpop.f32.mrf.mxu0 }
  0xdf   : > { %v352_v40 = vadd.f32 %v688_v38, %v351_v37  ;;  %v416_v49 = vmax.f32 %v360_v42, 0.0 }
  0xe0   : > { %v751_v39 = vpop.f32.mrf.mxu0 }
  0xe1   : > { %v363_v41 = vadd.f32 %v751_v39, %v688_v38  ;;  %v414_v47 = vmax.f32 %v352_v40, 0.0 }
  0xe2   : > { %v354_v43 = vpop.f32.mrf.mxu0 }
  0xe3   : > { %v355_v44 = vadd.f32 %v688_v38, %v354_v43  ;;  %v417_v45 = vmax.f32 %v363_v41, 0.0 }
  0xe4   : > { %v754_v46 = vpop.f32.mrf.mxu0 }
  0xe5   : > { %v415_v48 = vmax.f32 %v355_v44, 0.0  ;;  %v431_v52 = vpack.c.bf16 %v417_v45, %v416_v49  ;;  %v376_v56 = vadd.f32 %v754_v46, %v688_v38 }
  0xe6   : > { %v367_v50 = vpop.f32.mrf.mxu0 }
  0xe7   : > { %v430_v51 = vpack.c.bf16 %v415_v48, %v414_v47  ;;  %v368_v54 = vadd.f32 %v688_v38, %v367_v50  ;;  %v420_v63 = vmax.f32 %v376_v56, 0.0 }
  0xe8   : > { %v755_v53 = vpop.f32.mrf.mxu0 }
  0xe9   : > { %v379_v55 = vadd.f32 %v755_v53, %v688_v38  ;;  %780 = vmatprep.mubr.bf16.mxu0 %v430_v51  ;;  %v418_v61 = vmax.f32 %v368_v54, 0.0 }
  0xea   : > { %v370_v57 = vpop.f32.mrf.mxu0  ;;  %781 = vmatmul.mubr.bf16.vlgmr.msra.gmra.mxu0 %v431_v52 }
  0xeb   : > { %v371_v58 = vadd.f32 %v688_v38, %v370_v57  ;;  %v421_v59 = vmax.f32 %v379_v55, 0.0 }
  0xec   : > { %v758_v60 = vpop.f32.mrf.mxu0 }
  0xed   : > { %v419_v62 = vmax.f32 %v371_v58, 0.0  ;;  %v433_v2 = vpack.c.bf16 %v421_v59, %v420_v63  ;;  %v392_v6 = vadd.f32 %v758_v60, %v688_v38 }
  0xee   : > { %v383_v0 = vpop.f32.mrf.mxu0 }
  0xef   : > { %v432_v1 = vpack.c.bf16 %v419_v62, %v418_v61  ;;  %v384_v4 = vadd.f32 %v688_v38, %v383_v0  ;;  %v424_v13 = vmax.f32 %v392_v6, 0.0 }
  0xf0   : > { %v759_v3 = vpop.f32.mrf.mxu0 }
  0xf1   : > { %v395_v5 = vadd.f32 %v759_v3, %v688_v38  ;;  %784 = vmatprep.mubr.bf16.mxu1 %v432_v1  ;;  %v422_v11 = vmax.f32 %v384_v4, 0.0 }
  0xf2   : > { %v386_v7 = vpop.f32.mrf.mxu0  ;;  %785 = vmatmul.mubr.bf16.vlgmr.msra.gmra.mxu1 %v433_v2 }
  0xf3   : > { %v387_v8 = vadd.f32 %v688_v38, %v386_v7  ;;  %v425_v9 = vmax.f32 %v395_v5, 0.0 }
  0xf4   : > { %v762_v10 = vpop.f32.mrf.mxu0 }
  0xf5   : > { %v423_v12 = vmax.f32 %v387_v8, 0.0  ;;  %v435_v16 = vpack.c.bf16 %v425_v9, %v424_v13  ;;  %v408_v20 = vadd.f32 %v762_v10, %v688_v38 }
  0xf6   : > { %v399_v14 = vpop.f32.mrf.mxu0 }
  0xf7   : > { %v434_v15 = vpack.c.bf16 %v423_v12, %v422_v11  ;;  %v400_v18 = vadd.f32 %v688_v38, %v399_v14  ;;  %v428_v26 = vmax.f32 %v408_v20, 0.0 }
  0xf8   : > { %v763_v17 = vpop.f32.mrf.mxu0 }
  0xf9   : > { %v411_v19 = vadd.f32 %v763_v17, %v688_v38  ;;  %788 = vmatprep.mubr.bf16.mxu1 %v434_v15  ;;  %v426_v24 = vmax.f32 %v400_v18, 0.0 }
  0xfa   : > { %v402_v21 = vpop.f32.mrf.mxu0  ;;  %789 = vmatmul.mubr.bf16.gmra.mxu1 %v435_v16 }
  0xfb   : > { %v403_v22 = vadd.f32 %v688_v38, %v402_v21  ;;  %v429_v23 = vmax.f32 %v411_v19, 0.0 }
  0xfd   : > { %v427_v25 = vmax.f32 %v403_v22, 0.0  ;;  %v437_v28 = vpack.c.bf16 %v429_v23, %v428_v26 }
  0xff   : > { %v436_v27 = vpack.c.bf16 %v427_v25, %v426_v24 }
 0x101   : > { %792 = vmatprep.mubr.bf16.mxu1 %v436_v27 }
 0x102   : > { %793 = vmatmul.mubr.bf16.gmra.mxu1 %v437_v28 }
 0x1aa   : > { %v782_v30 = vpop.f32.mrf.mxu0 }
 0x1ab   : > { %v552_v31 = vadd.f32 %v782_v30, %v701_v29 }
 0x1ac   : > { %v543_v32 = vpop.f32.mrf.mxu0 }
 0x1ad   : > { %609 = vst.msk [vmem:[%s959_s8 + $0x10] sm:$0xff] %vm606_vm1, %v552_v31  ;;  %v544_v33 = vadd.f32 %v701_v29, %v543_v32 }
 0x1ae   : > { %v783_v34 = vpop.f32.mrf.mxu0 }
 0x1af   : > { %607 = vst.msk [vmem:[%s959_s8] sm:$0xff] %vm606_vm1, %v544_v33  ;;  %v555_v35 = vadd.f32 %v783_v34, %v701_v29 }
 0x1b0   : > { %v546_v36 = vpop.f32.mrf.mxu0 }
 0x1b1   : > { %610 = vst.msk [vmem:[%s959_s8 + $0x18] sm:$0xff] %vm606_vm1, %v555_v35  ;;  %v547_v37 = vadd.f32 %v701_v29, %v546_v36 }
 0x1b2   : > { %v786_v38 = vpop.f32.mrf.mxu1 }
 0x1b3   : > { %608 = vst.msk [vmem:[%s959_s8 + $0x8] sm:$0xff] %vm606_vm1, %v547_v37  ;;  %v568_v39 = vadd.f32 %v786_v38, %v701_v29 }
 0x1b4   : > { %v559_v40 = vpop.f32.mrf.mxu1 }
 0x1b5   : > { %613 = vst.msk [vmem:[%s959_s8 + $0x30] sm:$0xff] %vm606_vm1, %v568_v39  ;;  %v560_v41 = vadd.f32 %v701_v29, %v559_v40 }
 0x1b6   : > { %v787_v42 = vpop.f32.mrf.mxu1 }
 0x1b7   : > { %611 = vst.msk [vmem:[%s959_s8 + $0x20] sm:$0xff] %vm606_vm1, %v560_v41  ;;  %v571_v43 = vadd.f32 %v787_v42, %v701_v29 }
 0x1b8   : > { %v562_v44 = vpop.f32.mrf.mxu1 }
 0x1b9   : > { %614 = vst.msk [vmem:[%s959_s8 + $0x38] sm:$0xff] %vm606_vm1, %v571_v43  ;;  %v563_v45 = vadd.f32 %v701_v29, %v562_v44 }
 0x1ba   : > { %v790_v46 = vpop.f32.mrf.mxu1 }
 0x1bb   : > { %612 = vst.msk [vmem:[%s959_s8 + $0x28] sm:$0xff] %vm606_vm1, %v563_v45  ;;  %v584_v47 = vadd.f32 %v790_v46, %v701_v29 }
 0x1bc   : > { %v575_v48 = vpop.f32.mrf.mxu1 }
 0x1bd   : > { %617 = vst.msk [vmem:[%s959_s8 + $0x50] sm:$0xff] %vm606_vm1, %v584_v47  ;;  %v576_v49 = vadd.f32 %v701_v29, %v575_v48 }
 0x1be   : > { %v791_v50 = vpop.f32.mrf.mxu1 }
 0x1bf   : > { %615 = vst.msk [vmem:[%s959_s8 + $0x40] sm:$0xff] %vm606_vm1, %v576_v49  ;;  %v587_v51 = vadd.f32 %v791_v50, %v701_v29 }
 0x1c0   : > { %v578_v52 = vpop.f32.mrf.mxu1 }
 0x1c1   : > { %618 = vst.msk [vmem:[%s959_s8 + $0x58] sm:$0xff] %vm606_vm1, %v587_v51  ;;  %v579_v53 = vadd.f32 %v701_v29, %v578_v52 }
 0x1c2   : > { %v794_v54 = vpop.f32.mrf.mxu1 }
 0x1c3   : > { %616 = vst.msk [vmem:[%s959_s8 + $0x48] sm:$0xff] %vm606_vm1, %v579_v53  ;;  %v600_v55 = vadd.f32 %v794_v54, %v701_v29 }
 0x1c4   : > { %v591_v56 = vpop.f32.mrf.mxu1 }
 0x1c5   : > { %621 = vst.msk [vmem:[%s959_s8 + $0x70] sm:$0xff] %vm606_vm1, %v600_v55  ;;  %v592_v57 = vadd.f32 %v701_v29, %v591_v56 }
 0x1c6   : > { %v795_v58 = vpop.f32.mrf.mxu1 }
 0x1c7   : > { %619 = vst.msk [vmem:[%s959_s8 + $0x60] sm:$0xff] %vm606_vm1, %v592_v57  ;;  %v603_v59 = vadd.f32 %v795_v58, %v701_v29 }
 0x1c8   : > { %v594_v60 = vpop.f32.mrf.mxu1 }
 0x1c9   : > { %622 = vst.msk [vmem:[%s959_s8 + $0x78] sm:$0xff] %vm606_vm1, %v603_v59  ;;  %v595_v61 = vadd.f32 %v701_v29, %v594_v60 }
 0x1cb   : > { %620 = vst.msk [vmem:[%s959_s8 + $0x68] sm:$0xff] %vm606_vm1, %v595_v61 }
 0x1cc PF: > { %s15_s18 = sadd.s32 1, %s838_s18  }
 0x1cd   : > { %p12_p4 = scmp.ge.s32.totalorder %s15_s18, 6  }
 0x1cf   :  { %14 = sbr.rel (!%p12_p4) target bundleno = 1 (0x1), region = 70 }

</bundles_post_ra>
